<compile_context>
chip_gen: v7x
topology: tpu7x:2x2x1
jax: 0.10.0
libtpu: 0.0.40
codegen_flags: <defaults>
</compile_context>

<pallas_src>
import functools

import jax
import jax.numpy as jnp
import numpy as np
from jax.experimental import pallas as pl
from jax.experimental.pallas import tpu as pltpu


def _conv_relu_pool_kernel(x_ref, t_ref, b_ref, o_ref):
    """Fused 3x3 conv + 2x2 max-pool + bias + ReLU for one batch tile.

    x_ref: (nb, 2, Hh+1, Wp*Cin)  padded input rows split by row parity,
                                  each row flattened over (padded width, Cin)
    t_ref: (3, Wp*Cin, W*Cout)    per-kh banded weight matrix; columns ordered
                                  [even output cols | odd output cols], chan minor
    b_ref: (1, Wh*Cout)           bias tiled over pooled output columns (f32)
    o_ref: (nb, Hh, Wh*Cout)      pooled output tile (NHWC with W,C flattened)
    """
    nb = x_ref.shape[0]
    hh = x_ref.shape[2] - 1                 # pooled height
    ncol = t_ref.shape[2]                   # W * Cout
    nout = ncol // 2                        # Wh * Cout

    t0 = t_ref[0]                           # (Wp*Cin, W*Cout)
    t1 = t_ref[1]
    t2 = t_ref[2]
    bias = b_ref[...].astype(jnp.float32)   # (1, Wh*Cout)

    for img in range(nb):                   # static unroll over images in the tile
        xi = x_ref[img]                     # (2, Hh+1, Wp*Cin)
        # Padded input rows, grouped by parity:
        #   r0 = rows {0,2,..}, r1 = rows {1,3,..}, r2 = rows {2,4,..}, r3 = {3,5,..}
        r0 = xi[0, 0:hh, :]
        r1 = xi[1, 0:hh, :]
        r2 = xi[0, 1:hh + 1, :]
        r3 = xi[1, 1:hh + 1, :]

        # Even / odd conv output rows: 3 accumulated 2-D MXU matmuls each,
        # f32 accumulation.  Output columns are [even cols | odd cols].
        acc_e = jnp.dot(r0, t0, preferred_element_type=jnp.float32)
        acc_e = acc_e + jnp.dot(r1, t1, preferred_element_type=jnp.float32)
        acc_e = acc_e + jnp.dot(r2, t2, preferred_element_type=jnp.float32)

        acc_o = jnp.dot(r1, t0, preferred_element_type=jnp.float32)
        acc_o = acc_o + jnp.dot(r2, t1, preferred_element_type=jnp.float32)
        acc_o = acc_o + jnp.dot(r3, t2, preferred_element_type=jnp.float32)

        # 2x2 max-pool: W-pool = max of the two lane halves (even|odd cols),
        # H-pool = max of the even-row / odd-row accumulators.  Pure VPU work.
        pooled = jnp.maximum(
            jnp.maximum(acc_e[:, :nout], acc_e[:, nout:]),
            jnp.maximum(acc_o[:, :nout], acc_o[:, nout:]))

        # bias + ReLU after pooling (exactly equivalent: both are monotone).
        pooled = jnp.maximum(pooled + bias, 0.0)

        o_ref[img] = pooled.astype(o_ref.dtype)


def _banded_weights(weight, w_size, compute_dtype):
    """(Cout, Cin, 3, 3) OIHW conv weights -> (3, Wp*Cin, W*Cout) banded mats.

    Row index   = wi * Cin + ci   (padded input column wi, input channel ci)
    Column index= col * Cout + co, col in [0, W) maps to output column
                  w_of_col[col] with ordering [even cols | odd cols].
    """
    cout, cin = weight.shape[0], weight.shape[1]
    wp = w_size + 2
    w_of_col = jnp.concatenate(
        [jnp.arange(0, w_size, 2), jnp.arange(1, w_size, 2)])        # (W,)
    wi = jnp.arange(wp)
    kw = wi[:, None] - w_of_col[None, :]                             # (Wp, W)
    valid = (kw >= 0) & (kw <= 2)
    kw_c = jnp.clip(kw, 0, 2)
    w_t = jnp.transpose(weight, (2, 3, 1, 0))                        # (kh, kw, ci, co)
    t = w_t[:, kw_c]                                                 # (3, Wp, W, Cin, Cout)
    t = jnp.where(valid[None, :, :, None, None], t, 0.0)
    t = jnp.transpose(t, (0, 1, 3, 2, 4))                            # (3, Wp, Cin, W, Cout)
    return t.reshape(3, wp * cin, w_size * cout).astype(compute_dtype)


@functools.partial(jax.jit, static_argnames=("compute_dtype", "batch_block"))
def cnn_layer_forward(x_nchw, weight, bias, *,
                      compute_dtype=jnp.bfloat16, batch_block=None):
    """CNNLayer forward (conv3x3 s1 p1 -> ReLU -> maxpool2x2) on NCHW input."""
    n, cin, h, w = x_nchw.shape
    cout = weight.shape[0]
    assert h % 2 == 0 and w % 2 == 0, "maxpool 2x2 assumes even H, W"
    hh, wh = h // 2, w // 2
    hp, wp = h + 2, w + 2

    # ---- host prep: one data-movement pass over the input ----
    # NCHW -> NHWC, halo pad, split padded rows by parity, flatten (Wp, Cin).
    x_nhwc = jnp.transpose(x_nchw, (0, 2, 3, 1)).astype(compute_dtype)
    x_pad = jnp.pad(x_nhwc, ((0, 0), (1, 1), (1, 1), (0, 0)))
    x_prep = x_pad.reshape(n, hp // 2, 2, wp * cin).transpose(0, 2, 1, 3)

    t_mats = _banded_weights(weight, w, compute_dtype)                    # (3, Wp*Cin, W*Cout)
    b_row = jnp.tile(bias, wh).reshape(1, wh * cout).astype(jnp.float32)  # (1, Wh*Cout)

    # ---- batch tile size: amortize grid overhead, keep grid >= 2 (v7x 2 TCs) ----
    if batch_block is None:
        itemsize = jnp.dtype(compute_dtype).itemsize
        per_img = (2 * (2 * (hp // 2) * wp * cin * itemsize)   # double-buffered input
                   + 2 * (hh * wh * cout * 4))                 # double-buffered output
        budget = 8 * 1024 * 1024
        nb = 1
        for cand in range(1, min(n, 8) + 1):
            if n % cand:
                continue
            if cand * per_img > budget:
                continue
            if n > 1 and n // cand < 2:
                continue
            nb = cand
    else:
        nb = batch_block
    assert n % nb == 0

    out = pl.pallas_call(
        _conv_relu_pool_kernel,
        out_shape=jax.ShapeDtypeStruct((n, hh, wh * cout), jnp.float32),
        grid_spec=pltpu.PrefetchScalarGridSpec(
            num_scalar_prefetch=0,
            grid=(n // nb,),
            in_specs=[
                pl.BlockSpec((nb, 2, hp // 2, wp * cin), lambda b: (b, 0, 0, 0)),
                pl.BlockSpec((3, wp * cin, w * cout), lambda b: (0, 0, 0)),
                pl.BlockSpec((1, wh * cout), lambda b: (0, 0)),
            ],
            out_specs=pl.BlockSpec((nb, hh, wh * cout), lambda b: (b, 0, 0)),
        ),
        compiler_params=pltpu.CompilerParams(
            dimension_semantics=("parallel",),
            # <= 48 MiB keeps double-buffering on v7x (64 MiB physical); raise
            # toward ~100 MiB (and grow batch_block) on v5e/v6e (128 MiB).
            vmem_limit_bytes=48 * 1024 * 1024,
        ),
    )(x_prep, t_mats, b_row)

    # (N, Hh, Wh*Cout) -> NCHW to match the PyTorch module's output layout.
    # TODO(synk): drop this transpose (and the NHWC prep transpose) if the
    #             surrounding model keeps activations NHWC end-to-end.
    return out.reshape(n, hh, wh, cout).transpose(0, 3, 1, 2)


def _reference_forward(x_nchw, weight, bias):
    """Pure-JAX reference matching PyTorch semantics (for correctness check)."""
    y = jax.lax.conv_general_dilated(
        x_nchw, weight, window_strides=(1, 1), padding=((1, 1), (1, 1)),
        dimension_numbers=("NCHW", "OIHW", "NCHW"))
    y = y + bias.reshape(1, -1, 1, 1)
    y = jnp.maximum(y, 0.0)
    n, c, h, w = y.shape
    y = y.reshape(n, c, h // 2, 2, w // 2, 2)
    return jnp.max(y, axis=(3, 5))


if __name__ == "__main__":
    # Small deterministic setup: batch=2, in_channel=4, out_channel=8, 16x16.
    N, Cin, Cout, H, W = 2, 4, 8, 16, 16
    key = jax.random.PRNGKey(0)
    kx, kw_, kb = jax.random.split(key, 3)

    x = jax.random.normal(kx, (N, Cin, H, W), dtype=jnp.float32)
    fan_in = Cin * 3 * 3
    bound = 1.0 / np.sqrt(fan_in)
    weight = jax.random.uniform(kw_, (Cout, Cin, 3, 3), jnp.float32,
                                minval=-bound, maxval=bound)
    bias = jax.random.uniform(kb, (Cout,), jnp.float32,
                              minval=-bound, maxval=bound)

    ref = jax.block_until_ready(_reference_forward(x, weight, bias))

    # f32 matmul operands (tight check).
    out_f32 = jax.block_until_ready(
        cnn_layer_forward(x, weight, bias, compute_dtype=jnp.float32))
    assert out_f32.shape == (N, Cout, H // 2, W // 2), out_f32.shape
    np.testing.assert_allclose(np.asarray(out_f32), np.asarray(ref),
                               rtol=1e-4, atol=1e-4)

    # bf16 matmul operands, f32 accumulation/elementwise (default, v6e/v7x path).
    out_bf16 = jax.block_until_ready(
        cnn_layer_forward(x, weight, bias, compute_dtype=jnp.bfloat16))
    np.testing.assert_allclose(np.asarray(out_bf16), np.asarray(ref),
                               rtol=5e-2, atol=5e-2)

    print("KERNEL_OK")
</pallas_src>

<mosaic_0001>
module attributes {stable_mosaic.version = 11 : i64} {
  func.func @_conv_relu_pool_kernel(%arg0: i32, %arg1: memref<1x2x9x72xf32, #tpu.memory_space<vmem>>, %arg2: memref<3x72x128xf32, #tpu.memory_space<vmem>>, %arg3: memref<1x64xf32, #tpu.memory_space<vmem>>, %arg4: memref<1x8x64xf32, #tpu.memory_space<vmem>>) attributes {dimension_semantics = [#tpu.dimension_semantics<parallel>], iteration_bounds = array<i64: 2>, scalar_prefetch = 0 : i64, scratch_operands = 0 : i64, tpu.core_type = #tpu.core_type<tc>, window_params = [{transform_indices = @transform_0, window_bounds = array<i64: 1, 2, 9, 72>}, {pipeline_mode = #tpu.pipeline_mode<synchronous>, transform_indices = @transform_1, window_bounds = array<i64: 3, 72, 128>}, {pipeline_mode = #tpu.pipeline_mode<synchronous>, transform_indices = @transform_2, window_bounds = array<i64: 1, 64>}, {transform_indices = @transform_3, window_bounds = array<i64: 1, 8, 64>}]} {
    %c0 = arith.constant 0 : index
    %c0_0 = arith.constant 0 : index
    %c0_1 = arith.constant 0 : index
    %0 = vector.load %arg2[%c0, %c0_0, %c0_1] : memref<3x72x128xf32, #tpu.memory_space<vmem>>, vector<1x72x128xf32>
    %1 = vector.shape_cast %0 : vector<1x72x128xf32> to vector<72x128xf32>
    %c1 = arith.constant 1 : index
    %c0_2 = arith.constant 0 : index
    %c0_3 = arith.constant 0 : index
    %2 = vector.load %arg2[%c1, %c0_2, %c0_3] : memref<3x72x128xf32, #tpu.memory_space<vmem>>, vector<1x72x128xf32>
    %3 = vector.shape_cast %2 : vector<1x72x128xf32> to vector<72x128xf32>
    %c2 = arith.constant 2 : index
    %c0_4 = arith.constant 0 : index
    %c0_5 = arith.constant 0 : index
    %4 = vector.load %arg2[%c2, %c0_4, %c0_5] : memref<3x72x128xf32, #tpu.memory_space<vmem>>, vector<1x72x128xf32>
    %5 = vector.shape_cast %4 : vector<1x72x128xf32> to vector<72x128xf32>
    %c0_6 = arith.constant 0 : index
    %c0_7 = arith.constant 0 : index
    %6 = vector.load %arg3[%c0_6, %c0_7] : memref<1x64xf32, #tpu.memory_space<vmem>>, vector<1x64xf32>
    %c0_8 = arith.constant 0 : index
    %c0_9 = arith.constant 0 : index
    %c0_10 = arith.constant 0 : index
    %c0_11 = arith.constant 0 : index
    %7 = vector.load %arg1[%c0_8, %c0_9, %c0_10, %c0_11] : memref<1x2x9x72xf32, #tpu.memory_space<vmem>>, vector<1x2x9x72xf32>
    %8 = vector.shape_cast %7 : vector<1x2x9x72xf32> to vector<2x9x72xf32>
    %9 = vector.extract_strided_slice %8 {offsets = [0, 0, 0], sizes = [1, 8, 72], strides = [1, 1, 1]} : vector<2x9x72xf32> to vector<1x8x72xf32>
    %10 = vector.shape_cast %9 : vector<1x8x72xf32> to vector<8x72xf32>
    %11 = vector.extract_strided_slice %8 {offsets = [1, 0, 0], sizes = [1, 8, 72], strides = [1, 1, 1]} : vector<2x9x72xf32> to vector<1x8x72xf32>
    %12 = vector.shape_cast %11 : vector<1x8x72xf32> to vector<8x72xf32>
    %13 = vector.extract_strided_slice %8 {offsets = [0, 1, 0], sizes = [1, 8, 72], strides = [1, 1, 1]} : vector<2x9x72xf32> to vector<1x8x72xf32>
    %14 = vector.shape_cast %13 : vector<1x8x72xf32> to vector<8x72xf32>
    %15 = vector.extract_strided_slice %8 {offsets = [1, 1, 0], sizes = [1, 8, 72], strides = [1, 1, 1]} : vector<2x9x72xf32> to vector<1x8x72xf32>
    %16 = vector.shape_cast %15 : vector<1x8x72xf32> to vector<8x72xf32>
    %cst = arith.constant dense<0.000000e+00> : vector<8x128xf32>
    %17 = tpu.matmul %10, %1, %cst {dimension_numbers = #tpu.dot_dimension_numbers<[1], [0], [0], [1], [0, 0, 1, 1], [], []>} : vector<8x72xf32>, vector<72x128xf32>, vector<8x128xf32> -> vector<8x128xf32>
    %cst_12 = arith.constant dense<0.000000e+00> : vector<8x128xf32>
    %18 = tpu.matmul %12, %3, %cst_12 {dimension_numbers = #tpu.dot_dimension_numbers<[1], [0], [0], [1], [0, 0, 1, 1], [], []>} : vector<8x72xf32>, vector<72x128xf32>, vector<8x128xf32> -> vector<8x128xf32>
    %19 = arith.addf %17, %18 : vector<8x128xf32>
    %cst_13 = arith.constant dense<0.000000e+00> : vector<8x128xf32>
    %20 = tpu.matmul %14, %5, %cst_13 {dimension_numbers = #tpu.dot_dimension_numbers<[1], [0], [0], [1], [0, 0, 1, 1], [], []>} : vector<8x72xf32>, vector<72x128xf32>, vector<8x128xf32> -> vector<8x128xf32>
    %21 = arith.addf %19, %20 : vector<8x128xf32>
    %cst_14 = arith.constant dense<0.000000e+00> : vector<8x128xf32>
    %22 = tpu.matmul %12, %1, %cst_14 {dimension_numbers = #tpu.dot_dimension_numbers<[1], [0], [0], [1], [0, 0, 1, 1], [], []>} : vector<8x72xf32>, vector<72x128xf32>, vector<8x128xf32> -> vector<8x128xf32>
    %cst_15 = arith.constant dense<0.000000e+00> : vector<8x128xf32>
    %23 = tpu.matmul %14, %3, %cst_15 {dimension_numbers = #tpu.dot_dimension_numbers<[1], [0], [0], [1], [0, 0, 1, 1], [], []>} : vector<8x72xf32>, vector<72x128xf32>, vector<8x128xf32> -> vector<8x128xf32>
    %24 = arith.addf %22, %23 : vector<8x128xf32>
    %cst_16 = arith.constant dense<0.000000e+00> : vector<8x128xf32>
    %25 = tpu.matmul %16, %5, %cst_16 {dimension_numbers = #tpu.dot_dimension_numbers<[1], [0], [0], [1], [0, 0, 1, 1], [], []>} : vector<8x72xf32>, vector<72x128xf32>, vector<8x128xf32> -> vector<8x128xf32>
    %26 = arith.addf %24, %25 : vector<8x128xf32>
    %27 = vector.extract_strided_slice %21 {offsets = [0, 0], sizes = [8, 64], strides = [1, 1]} : vector<8x128xf32> to vector<8x64xf32>
    %28 = vector.extract_strided_slice %21 {offsets = [0, 64], sizes = [8, 64], strides = [1, 1]} : vector<8x128xf32> to vector<8x64xf32>
    %29 = arith.maximumf %27, %28 : vector<8x64xf32>
    %30 = vector.extract_strided_slice %26 {offsets = [0, 0], sizes = [8, 64], strides = [1, 1]} : vector<8x128xf32> to vector<8x64xf32>
    %31 = vector.extract_strided_slice %26 {offsets = [0, 64], sizes = [8, 64], strides = [1, 1]} : vector<8x128xf32> to vector<8x64xf32>
    %32 = arith.maximumf %30, %31 : vector<8x64xf32>
    %33 = arith.maximumf %29, %32 : vector<8x64xf32>
    %34 = vector.broadcast %6 : vector<1x64xf32> to vector<8x64xf32>
    %35 = arith.addf %33, %34 : vector<8x64xf32>
    %cst_17 = arith.constant 0.000000e+00 : f32
    %36 = vector.broadcast %cst_17 : f32 to vector<8x64xf32>
    %37 = arith.maximumf %35, %36 : vector<8x64xf32>
    %c0_18 = arith.constant 0 : index
    %c0_19 = arith.constant 0 : index
    %c0_20 = arith.constant 0 : index
    %38 = vector.load %arg4[%c0_18, %c0_19, %c0_20] : memref<1x8x64xf32, #tpu.memory_space<vmem>>, vector<1x8x64xf32>
    %39 = vector.shape_cast %38 : vector<1x8x64xf32> to vector<8x64xf32>
    %40 = vector.shape_cast %37 : vector<8x64xf32> to vector<1x8x64xf32>
    tpu.vector_store %arg4[%c0_18, %c0_19, %c0_20], %40 {strides = array<i32>} : memref<1x8x64xf32, #tpu.memory_space<vmem>>, vector<1x8x64xf32>,
    return
  }
  func.func @transform_0(%arg0: i32) -> (i32, i32, i32, i32) {
    %c0_i32 = arith.constant 0 : i32
    %c0_i32_0 = arith.constant 0 : i32
    %c0_i32_1 = arith.constant 0 : i32
    %c0_i32_2 = arith.constant 0 : i32
    return %arg0, %c0_i32, %c0_i32_0, %c0_i32_1 : i32, i32, i32, i32
  }
  func.func @transform_1(%arg0: i32) -> (i32, i32, i32) {
    %c0_i32 = arith.constant 0 : i32
    %c0_i32_0 = arith.constant 0 : i32
    %c0_i32_1 = arith.constant 0 : i32
    %c0_i32_2 = arith.constant 0 : i32
    return %c0_i32, %c0_i32_0, %c0_i32_1 : i32, i32, i32
  }
  func.func @transform_2(%arg0: i32) -> (i32, i32) {
    %c0_i32 = arith.constant 0 : i32
    %c0_i32_0 = arith.constant 0 : i32
    %c0_i32_1 = arith.constant 0 : i32
    return %c0_i32, %c0_i32_0 : i32, i32
  }
  func.func @transform_3(%arg0: i32) -> (i32, i32, i32) {
    %c0_i32 = arith.constant 0 : i32
    %c0_i32_0 = arith.constant 0 : i32
    %c0_i32_1 = arith.constant 0 : i32
    return %arg0, %c0_i32, %c0_i32_0 : i32, i32, i32
  }
}

</mosaic_0001>

<bundles_post_ra>
// kernel: tile.8
= control target key start
LH: loop header
LB: loop body
LE: loop exit
PB: predicated region body
PF: predicated region fallthrough
CT: control target
= control target key end

     0   :  { %s22_s0 = inlined_call_operand.vmem [shape: f32[8], index: 0, kind: input, shape index: {}]   ;;  %s23_s1 = inlined_call_operand.vmem [shape: f32[8,8], index: 1, kind: output, shape index: {}]  }
   0x1   :  { %v4_v0 = vld [vmem:[%s22_s0] ss:$0 sm:$0xff] }
   0x2   :  { %5 = vst [vmem:[%s23_s1] sm:$0xff] %v4_v0 }

// kernel: tile.9
= control target key start
LH: loop header
LB: loop body
LE: loop exit
PB: predicated region body
PF: predicated region fallthrough
CT: control target
= control target key end

     0   :  { %s67_s10 = smov 56   ;;  %s68_s11 = smov 40   ;;  %vm3_vm0 = vcmask 64512   ;;  %vm9_vm1 = vcmask 523712   ;;  %vm15_vm2 = vcmask 458112   ;;  %vm21_vm3 = vcmask 392512   ;;  %s111_s0 = inlined_call_operand.vmem [shape: f32[8,8], index: 0, kind: input, shape index: {}]   ;;  %s112_s1 = inlined_call_operand.vmem [shape: f32[1,64], index: 1, kind: output, shape index: {}]  }
   0x1   :  { %v53_v0 = vld [vmem:[%s111_s0 + $0x7] sm:$0x1]   ;;  %v55_v1 = vld [vmem:[%s111_s0 + $0x5] sm:$0x1]   ;;  %v54_v2 = vld [vmem:[%s111_s0 + $0x6] sm:$0x1]  }
   0x2   :  { %7 = vrot.lane.b32.xlu0 %v53_v0, %s67_s10  ;;  %19 = vrot.lane.b32.xlu1 %v55_v1, %s68_s11  ;;  %v56_v3 = vld [vmem:[%s111_s0 + $0x4] sm:$0x1]   ;;  %v2_v4 = vld [vmem:[%s111_s0] sm:$0x1]   ;;  %s69_s18 = smov 48   ;;  %s70_s19 = smov 32  }
   0x3   :  { %4 = vst.msk [vmem:[#allocation0] sm:$0x1] %vm3_vm0, %v2_v4   ;;  %v57_v5 = vld [vmem:[%s111_s0 + $0x3] sm:$0x1]   ;;  %v58_v6 = vld [vmem:[%s111_s0 + $0x2] sm:$0x1]  }
   0x4   :  { %s71_s24 = smov 24   ;;  %s72_s25 = smov 16   ;;  %v59_v7 = vld [vmem:[%s111_s0 + $0x1] sm:$0x1]   ;;  %vm27_vm4 = vcmask 326912   ;;  %vm33_vm5 = vcmask 261312  }
   0x5   :  { %s73_s0 = smov 8   ;;  %vm39_vm6 = vcmask 195712   ;;  %vm45_vm7 = vcmask 130112  }
   0x6   :  { %13 = vrot.lane.b32.xlu0 %v54_v2, %s69_s18  ;;  %25 = vrot.lane.b32.xlu1 %v56_v3, %s70_s19 }
   0xa   :  { %31 = vrot.lane.b32.xlu0 %v57_v5, %s71_s24  ;;  %37 = vrot.lane.b32.xlu1 %v58_v6, %s72_s25 }
   0xe   :  { %43 = vrot.lane.b32.xlu0 %v59_v7, %s73_s0 }
  0x74   :  { %v8_v8 = vpop.permute.xlu0 %7   ;;  %v20_v9 = vpop.permute.xlu1 %19  }
  0x75   :  { %10 = vst.msk [vmem:[#allocation0] sm:$0x1] %vm9_vm1, %v8_v8  }
  0x78   :  { %v14_v10 = vpop.permute.xlu0 %13   ;;  %v26_v11 = vpop.permute.xlu1 %25  }
  0x79   :  { %16 = vst.msk [vmem:[#allocation0] sm:$0x1] %vm15_vm2, %v14_v10  }
  0x7a   :  { %22 = vst.msk [vmem:[#allocation0] sm:$0x1] %vm21_vm3, %v20_v9  }
  0x7b   :  { %28 = vst.msk [vmem:[#allocation0] sm:$0x1] %vm27_vm4, %v26_v11  }
  0x7c   :  { %v32_v12 = vpop.permute.xlu0 %31   ;;  %v38_v13 = vpop.permute.xlu1 %37  }
  0x7d   :  { %34 = vst.msk [vmem:[#allocation0] sm:$0x1] %vm33_vm5, %v32_v12  }
  0x7e   :  { %40 = vst.msk [vmem:[#allocation0] sm:$0x1] %vm39_vm6, %v38_v13  }
  0x80   :  { %v44_v14 = vpop.permute.xlu0 %43  }
  0x81   :  { %46 = vst.msk [vmem:[#allocation0] sm:$0x1] %vm45_vm7, %v44_v14  }
  0x88   :  { %v50_v15 = vld [vmem:[#allocation0] sm:$0x1] }
  0x89   :  { %52 = vst [vmem:[%s112_s1] sm:$0x1] %v50_v15 }

// kernel: cnn_layer_forward.1
= control target key start
LH: loop header
LB: loop body
LE: loop exit
PB: predicated region body
PF: predicated region fallthrough
CT: control target
= control target key end

     0   :  { %s1065_s12 = smov 0   ;;  %s1235_s0 = inlined_call_operand.vmem [shape: f32[2,2,9,72], index: 0, kind: input, shape index: {}]   ;;  %s1236_s1 = inlined_call_operand.vmem [shape: f32[3,72,128], index: 1, kind: input, shape index: {}]   ;;  %s1237_s2 = inlined_call_operand.vmem [shape: f32[1,64], index: 2, kind: input, shape index: {}]   ;;  %s1238_s3 = inlined_call_operand.vmem [shape: f32[2,8,64], index: 3, kind: output, shape index: {}]  }
   0x1 LB: > { %s719_s13 = sadd.s32 4294967295, %s1039_s12   ;;  %p723_p0 = scmp.ge.s32.totalorder %s1039_s12, 1  ;;  %s1039_s12 = sphi %s1065_s12, %s13_s12  }
   0x2   : > { %p137_p1 = scmp.lt.s32.totalorder %s1039_s12, 3 }
   0x4   : > { %p138_p2 = pnand %p723_p0, %p137_p1 }
   0x5   : > { %v727_v0 = vld [vmem:[%s1236_s1 + $0x48] sm:$0xff] (!%p138_p2)  ;;  %v728_v1 = vld [vmem:[%s1236_s1 + $0x50] sm:$0xff] (!%p138_p2)  ;;  %v729_v2 = vld [vmem:[%s1236_s1 + $0x58] sm:$0xff] (!%p138_p2)  ;;  %v1041_v3 = vmov (!%p138_p2), 0.0|0.0   ;;  %p160_p3 = scmp.lt.s32.totalorder (!%p138_p2), %s719_s13, 1  ;;  %vm1042_vm0 = vmmov (!%p138_p2), 0  }
   0x6   : > { %141 = sbr.rel (%p138_p2) target bundleno = 403 (0x193), region = 32  ;;  %941 = vmatprep.subr.bf16.mxu0 (!%p138_p2), %v1041_v3  ;;  %977 = vmatprep.subr.bf16.mxu1 (!%p138_p2), %v1041_v3  ;;  %v942_v4 = vpack.c.bf16 (!%p138_p2), %v728_v1, %v727_v0  ;;  %v730_v5 = vld [vmem:[%s1236_s1 + $0x60] sm:$0xff] (!%p138_p2)  ;;  %v1043_v6 = vmov (!%p138_p2), 0.0   ;;  %v731_v8 = vld [vmem:[%s1236_s1 + $0x68] sm:$0xff] (!%p138_p2)  ;;  %v732_v9 = vld [vmem:[%s1236_s1 + $0x70] sm:$0xff] (!%p138_p2)  ;;  %vm351_vm1 = vcmask (!%p138_p2), 1046528  }
   0x7   : > { %833 = vmatprep.mubr.msk.f32.mxu0 (!%p138_p2), %vm1042_vm0, %v1043_v6  ;;  %896 = vmatprep.mubr.msk.f32.mxu1 (!%p138_p2), %vm1042_vm0, %v1043_v6  ;;  %v945_v7 = vpack.c.bf16 (!%p138_p2), %v730_v5, %v729_v2  ;;  %v948_v10 = vpack.c.bf16 (!%p138_p2), %v732_v9, %v731_v8  ;;  %v733_v11 = vld [vmem:[%s1236_s1 + $0x78] sm:$0xff] (!%p138_p2)  ;;  %v734_v12 = vld [vmem:[%s1236_s1 + $0x80] sm:$0xff] (!%p138_p2)  ;;  %v170_v19 = vld [vmem:[%s1236_s1 + $0x8] sm:$0xff] (!%p138_p2)  ;;  %vm203_vm2 = vcmask (!%p138_p2), 588800   ;;  %vm664_vm3 = vcmask (!%p138_p2), 523264  }
   0x8   : > { %943 = vmatpush3.bf16.msra.mxu0 (!%p138_p2), %v942_v4  ;;  %979 = vmatpush3.bf16.msra.mxu1 (!%p138_p2), %v942_v4  ;;  %v951_v13 = vpack.c.bf16 (!%p138_p2), %v734_v12, %v733_v11  ;;  %v169_v18 = vld [vmem:[%s1236_s1] sm:$0xff] (!%p138_p2)  ;;  %v735_v20 = vld [vmem:[%s1236_s1 + $0x88] sm:$0xff] (!%p138_p2)  ;;  %v171_v24 = vld [vmem:[%s1236_s1 + $0x10] sm:$0xff] (!%p138_p2) }
   0x9   : > { %944 = vmatprep.subr.bf16.mxu0 (!%p138_p2), %v1041_v3  ;;  %980 = vmatprep.subr.bf16.mxu1 (!%p138_p2), %v1041_v3  ;;  %v954_v22 = vpack.c.bf16 (!%p138_p2), %v170_v19, %v169_v18  ;;  %v172_v25 = vld [vmem:[%s1236_s1 + $0x18] sm:$0xff] (!%p138_p2)  ;;  %v173_v27 = vld [vmem:[%s1236_s1 + $0x20] sm:$0xff] (!%p138_p2)  ;;  %v174_v28 = vld [vmem:[%s1236_s1 + $0x28] sm:$0xff] (!%p138_p2) }
   0xa   : > { %v957_v26 = vpack.c.bf16 (!%p138_p2), %v172_v25, %v171_v24  ;;  %v960_v29 = vpack.c.bf16 (!%p138_p2), %v174_v28, %v173_v27  ;;  %v175_v30 = vld [vmem:[%s1236_s1 + $0x30] sm:$0xff] (!%p138_p2)  ;;  %v176_v31 = vld [vmem:[%s1236_s1 + $0x38] sm:$0xff] (!%p138_p2)  ;;  %v177_v35 = vld [vmem:[%s1236_s1 + $0x40] sm:$0xff] (!%p138_p2) }
   0xb   : > { %v963_v32 = vpack.c.bf16 (!%p138_p2), %v176_v31, %v175_v30  ;;  %v736_v33 = vld [vmem:[%s1236_s1 + $0x90] sm:$0xff] (!%p138_p2)  ;;  %v737_v34 = vld [vmem:[%s1236_s1 + $0x98] sm:$0xff] (!%p138_p2)  ;;  %v738_v37 = vld [vmem:[%s1236_s1 + $0xa0] sm:$0xff] (!%p138_p2) }
   0xc   : > { %946 = vmatpush3.bf16.msra.mxu0 (!%p138_p2), %v945_v7  ;;  %982 = vmatpush3.bf16.msra.mxu1 (!%p138_p2), %v945_v7  ;;  %v966_v36 = vpack.c.bf16 (!%p138_p2), %v737_v34, %v736_v33  ;;  %v739_v38 = vld [vmem:[%s1236_s1 + $0xa8] sm:$0xff] (!%p138_p2)  ;;  %v740_v40 = vld [vmem:[%s1236_s1 + $0xb0] sm:$0xff] (!%p138_p2)  ;;  %v741_v41 = vld [vmem:[%s1236_s1 + $0xb8] sm:$0xff] (!%p138_p2) }
   0xd   : > { %s1240_s13 = smov (!%p160_p3, %s719_s13), 1  ;;  %947 = vmatprep.subr.bf16.mxu0 %v1041_v3  ;;  %983 = vmatprep.subr.bf16.mxu1 %v1041_v3  ;;  %v969_v39 = vpack.c.bf16 %v739_v38, %v738_v37  ;;  %v972_v42 = vpack.c.bf16 %v741_v41, %v740_v40  ;;  %v742_v43 = vld [vmem:[%s1236_s1 + $0xc0] sm:$0xff]  ;;  %v743_v44 = vld [vmem:[%s1236_s1 + $0xc8] sm:$0xff]  ;;  %v744_v49 = vld [vmem:[%s1236_s1 + $0xd0] sm:$0xff] }
   0xe   : > { %s754_s26 = sshll.u32 %s1240_s13, 5  ;;  %v975_v46 = vpack.c.bf16 %v743_v44, %v742_v43  ;;  %v751_v59 = vld [vmem:[%s1237_s2] ss:$0 sm:$0xff]  ;;  %s726_s25 = sshll.u32 %s1240_s13, 3 }
   0xf   : > { %s1113_s6 = scalar_lea.vmem %s1235_s0, %s754_s26  ;;  %s168_s28 = scalar_lea.vmem %s1238_s3, %s726_s25 }
  0x10   : > { %949 = vmatpush3.bf16.msra.mxu0 %v948_v10  ;;  %985 = vmatpush3.bf16.msra.mxu1 %v948_v10  ;;  %v199_v14 = vld [vmem:[%s1113_s6] sm:$0xff]  ;;  %v200_v15 = vld [vmem:[%s1113_s6 + $0x8] sm:$0x1]  ;;  %v1131_v21 = vld [vmem:[%s1113_s6 + $0x10] sm:$0xff] }
  0x11   : > { %950 = vmatprep.subr.bf16.mxu0 %v1041_v3  ;;  %986 = vmatprep.subr.bf16.mxu1 %v1041_v3  ;;  %v352_v16 = vrot.slane %v199_v14, 1  ;;  %v353_v17 = vrot.slane %v200_v15, 1  ;;  %v202_v45 = vld [vmem:[%s1113_s6 + $0x18] sm:$0x1]  ;;  %v569_v47 = vrot.slane %v1131_v21, 1  ;;  %s1044_s6 = smov 64  }
  0x12   : > { %v570_v48 = vrot.slane %v202_v45, 1 }
  0x13   : > { %v1134_v23 = vsel %vm351_vm1, %v352_v16, %v353_v17 }
  0x14   : > { %952 = vmatpush3.bf16.msra.mxu0 %v951_v13  ;;  %988 = vmatpush3.bf16.msra.mxu1 %v951_v13  ;;  %v571_v50 = vsel %vm351_vm1, %v569_v47, %v570_v48 }
  0x15   : > { %831 = vmatprep.subr.mxu0 %v1043_v6  ;;  %894 = vmatprep.subr.mxu1 %v1043_v6 }
  0x18   : > { %832 = vmatpush3.msra.mxu0 %v735_v20  ;;  %895 = vmatpush3.msra.mxu1 %v735_v20 }
  0x19   : > { %953 = vmatprep.subr.bf16.mxu0 %v1041_v3  ;;  %989 = vmatprep.subr.bf16.mxu1 %v1041_v3 }
  0x1a   : > { %834 = vmatmul.mubr.msk.f32.vlgmr.msra.gmra.mrb[0].mxu0 %vm203_vm2, %v1131_v21  ;;  %897 = vmatmul.mubr.msk.f32.vlgmr.msra.gmra.mrb[0].mxu1 %vm203_vm2, %v1134_v23 }
  0x1b   : > { %955 = vmatpush3.bf16.msra.mxu0 %v954_v22  ;;  %991 = vmatpush3.bf16.msra.mxu1 %v954_v22 }
  0x1c   : > { %956 = vmatprep.subr.bf16.mxu0 %v1041_v3  ;;  %992 = vmatprep.subr.bf16.mxu1 %v1041_v3 }
  0x1d   : > { %854 = vmatprep.mubr.msk.f32.mxu0 %vm1042_vm0, %v1043_v6  ;;  %917 = vmatprep.mubr.msk.f32.mxu1 %vm1042_vm0, %v1043_v6 }
  0x1f   : > { %958 = vmatpush3.bf16.msra.mxu0 %v957_v26  ;;  %994 = vmatpush3.bf16.msra.mxu1 %v957_v26 }
  0x20   : > { %959 = vmatprep.subr.bf16.mxu0 %v1041_v3  ;;  %995 = vmatprep.subr.bf16.mxu1 %v1041_v3 }
  0x23   : > { %961 = vmatpush3.bf16.msra.mxu0 %v960_v29  ;;  %997 = vmatpush3.bf16.msra.mxu1 %v960_v29 }
  0x24   : > { %962 = vmatprep.subr.bf16.mxu0 %v1041_v3  ;;  %998 = vmatprep.subr.bf16.mxu1 %v1041_v3 }
  0x27   : > { %964 = vmatpush3.bf16.msra.mxu0 %v963_v32  ;;  %1000 = vmatpush3.bf16.msra.mxu1 %v963_v32 }
  0x28   : > { %852 = vmatprep.subr.mxu0 %v1043_v6  ;;  %915 = vmatprep.subr.mxu1 %v1043_v6 }
  0x2b   : > { %853 = vmatpush3.msra.mxu0 %v177_v35  ;;  %916 = vmatpush3.msra.mxu1 %v177_v35 }
  0x2c   : > { %965 = vmatprep.subr.bf16.mxu0 %v1041_v3  ;;  %1001 = vmatprep.subr.bf16.mxu1 %v1041_v3 }
  0x2d   : > { %855 = vmatmul.mubr.msk.f32.vlgmr.msra.gmra.mrb[0].mxu0 %vm203_vm2, %v199_v14  ;;  %918 = vmatmul.mubr.msk.f32.vlgmr.msra.gmra.mrb[0].mxu1 %vm203_vm2, %v1131_v21 }
  0x2e   : > { %967 = vmatpush3.bf16.msra.mxu0 %v966_v36  ;;  %1003 = vmatpush3.bf16.msra.mxu1 %v966_v36 }
  0x2f   : > { %968 = vmatprep.subr.bf16.mxu0 %v1041_v3  ;;  %1004 = vmatprep.subr.bf16.mxu1 %v1041_v3 }
  0x30   : > { %875 = vmatprep.mubr.msk.f32.mxu0 %vm1042_vm0, %v1043_v6  ;;  %938 = vmatprep.mubr.msk.f32.mxu1 %vm1042_vm0, %v1043_v6 }
  0x32   : > { %970 = vmatpush3.bf16.msra.mxu0 %v969_v39  ;;  %1006 = vmatpush3.bf16.msra.mxu1 %v969_v39 }
  0x33   : > { %971 = vmatprep.subr.bf16.mxu0 %v1041_v3  ;;  %1007 = vmatprep.subr.bf16.mxu1 %v1041_v3 }
  0x36   : > { %973 = vmatpush3.bf16.msra.mxu0 %v972_v42  ;;  %1009 = vmatpush3.bf16.msra.mxu1 %v972_v42 }
  0x37   : > { %974 = vmatprep.subr.bf16.mxu0 %v1041_v3  ;;  %1010 = vmatprep.subr.bf16.mxu1 %v1041_v3 }
  0x3a   : > { %976 = vmatpush3.bf16.msra.mxu0 %v975_v46  ;;  %1012 = vmatpush3.bf16.msra.mxu1 %v975_v46 }
  0x3b   : > { %873 = vmatprep.subr.mxu0 %v1043_v6  ;;  %936 = vmatprep.subr.mxu1 %v1043_v6 }
  0x3e   : > { %874 = vmatpush3.msra.mxu0 %v744_v49  ;;  %937 = vmatpush3.msra.mxu1 %v744_v49 }
  0x3f   : > { %876 = vmatmul.mubr.msk.f32.vlgmr.msra.gmra.mrb[0].mxu0 %vm203_vm2, %v1134_v23  ;;  %939 = vmatmul.mubr.msk.f32.vlgmr.msra.gmra.mrb[0].mxu1 %vm203_vm2, %v571_v50 }
 0x112   : > { %v423_v51 = vpop.f32.mrb[0].mxu0  ;;  %v640_v52 = vpop.f32.mrb[0].mxu1 }
 0x113   : > { %v940_v53 = vpop.f32.mrb[1].mxu1  ;;  %646 = vrot.lane.b32.xlu0 %v423_v51, %s1044_s6  ;;  %v877_v54 = vpop.f32.mrb[1].mxu0 }
 0x117   : > { %651 = vrot.lane.b32.xlu0 %v640_v52, %s1044_s6 }
 0x185   : > { %v647_v55 = vpop.permute.xlu0 %646 }
 0x186   : > { %v649_v57 = vmax.f32 %v423_v51, %v647_v55 }
 0x189   : > { %v652_v56 = vpop.permute.xlu0 %651 }
 0x18a   : > { %v654_v58 = vmax.f32 %v640_v52, %v652_v56 }
 0x18c   : > { %v655_v60 = vmax.f32 %v649_v57, %v654_v58 }
 0x18e   : > { %v662_v61 = vadd.f32 %v751_v59, %v655_v60 }
 0x190   : > { %v663_v62 = vmax.f32 %v662_v61, 0.0 }
 0x192   : > { %665 = vst.msk [vmem:[%s168_s28] sm:$0xff] %vm664_vm3, %v663_v62 }
 0x193 PF: > { %s13_s12 = sadd.s32 1, %s1039_s12  }
 0x194   : > { %p10_p4 = scmp.ge.s32.totalorder %s13_s12, 4  }
 0x196   :  { %12 = sbr.rel (!%p10_p4) target bundleno = 1 (0x1), region = 64 }

</bundles_post_ra>
